<compile_context>
chip_gen: v5e
topology: v5e:2x2
jax: 0.10.0
libtpu: 0.0.40
codegen_flags: <defaults>
</compile_context>

<pallas_src>
import math
import functools

import jax
import jax.numpy as jnp
from jax.experimental import pallas as pl
from jax.experimental.pallas import tpu as pltpu

EPS = 1e-5


def _layernorm(x, w, b):
    mu = jnp.mean(x, axis=-1, keepdims=True)
    var = jnp.mean((x - mu) ** 2, axis=-1, keepdims=True)
    return (x - mu) * jax.lax.rsqrt(var + EPS) * w + b


def _transformer_block_kernel(x_ref,
                              ln1w_ref, ln1b_ref,
                              wqkv_ref, bqkv_ref,
                              wo_ref, bo_ref,
                              ln2w_ref, ln2b_ref,
                              w1_ref, b1_ref,
                              w2_ref, b2_ref,
                              o_ref,
                              *, num_heads, head_dim):
    # x_ref block: (S, E) for the current batch element (leading dim squeezed).
    x = x_ref[...].astype(jnp.float32)
    S, E = x.shape
    hd = head_dim

    # ---------------- LayerNorm 1 ----------------
    xn = _layernorm(x, ln1w_ref[...], ln1b_ref[...])                  # (S, E) f32
    xn_h = jnp.broadcast_to(xn.astype(jnp.bfloat16)[None, :, :],
                            (num_heads, S, E))                        # (H, S, E)

    # ---------------- Fused QKV projection (one head-batched matmul) --------
    # wqkv: (H, E, 3*hd) bf16, pre-transposed on host -> no in-kernel .T
    qkv = jnp.einsum('hse,hed->hsd', xn_h, wqkv_ref[...],
                     preferred_element_type=jnp.float32) + bqkv_ref[...]  # (H, S, 3hd)

    scale = 1.0 / math.sqrt(hd)
    q = (qkv[:, :, :hd] * scale).astype(jnp.bfloat16)                 # (H, S, hd)
    k = qkv[:, :, hd:2 * hd].astype(jnp.bfloat16)                     # (H, S, hd)
    v = qkv[:, :, 2 * hd:].astype(jnp.bfloat16)                       # (H, S, hd)

    # ---------------- Scaled dot-product attention (head-batched) -----------
    s = jnp.einsum('hqd,hkd->hqk', q, k,
                   preferred_element_type=jnp.float32)                # (H, S, S)
    s = s - jnp.max(s, axis=-1, keepdims=True)
    p = jnp.exp(s)
    p = p * pl.reciprocal(jnp.sum(p, axis=-1, keepdims=True), approx=True)

    ctx = jnp.einsum('hqk,hkd->hqd', p.astype(jnp.bfloat16), v,
                     preferred_element_type=jnp.float32)              # (H, S, hd)

    # Output projection accumulated per head (no concatenate).
    attn_h = jnp.einsum('hqd,hde->hqe', ctx.astype(jnp.bfloat16), wo_ref[...],
                        preferred_element_type=jnp.float32)           # (H, S, E)
    attn = jnp.sum(attn_h, axis=0) + bo_ref[...]                      # (S, E)

    x1 = x + attn                                                     # residual 1

    # ---------------- LayerNorm 2 + MLP ----------------
    xn2 = _layernorm(x1, ln2w_ref[...], ln2b_ref[...])
    h1 = jnp.dot(xn2.astype(jnp.bfloat16), w1_ref[...],
                 preferred_element_type=jnp.float32) + b1_ref[...]    # (S, Hm)
    g = 0.5 * h1 * (1.0 + jax.lax.erf(h1 * (1.0 / math.sqrt(2.0))))   # exact GELU
    h2 = jnp.dot(g.astype(jnp.bfloat16), w2_ref[...],
                 preferred_element_type=jnp.float32) + b2_ref[...]    # (S, E)

    o_ref[...] = (x1 + h2).astype(o_ref.dtype)                        # residual 2


def transformer_block(x_sbe, params, *, num_heads):
    """x_sbe: (S, B, E) as in the PyTorch module (batch_first=False)."""
    S, B, E = x_sbe.shape
    head_dim = E // num_heads
    H = params["w1"].shape[0]  # mlp hidden

    x_bse = jnp.transpose(x_sbe, (1, 0, 2))  # (B, S, E)

    f32, bf16 = jnp.float32, jnp.bfloat16
    ipw = params["in_proj_w"]                # (3E, E)
    ipb = params["in_proj_b"]                # (3E,)

    def head_split_T(w2d):                   # (E, E) -> (nh, E, hd), pre-transposed
        return jnp.transpose(w2d.reshape(num_heads, head_dim, E), (0, 2, 1))

    # Fused per-head QKV weight (H, E, 3*hd) and bias (H, 1, 3*hd).
    wqkv = jnp.concatenate(
        [head_split_T(ipw[:E]), head_split_T(ipw[E:2 * E]), head_split_T(ipw[2 * E:])],
        axis=-1).astype(bf16)
    bqkv = jnp.concatenate(
        [ipb[:E].reshape(num_heads, 1, head_dim),
         ipb[E:2 * E].reshape(num_heads, 1, head_dim),
         ipb[2 * E:].reshape(num_heads, 1, head_dim)],
        axis=-1).astype(f32)

    # out_proj: concat-dim rows of W_out^T, split per head -> (nh, hd, E)
    wo = jnp.transpose(params["out_proj_w"]).reshape(num_heads, head_dim, E).astype(bf16)
    bo = params["out_proj_b"].reshape(1, E).astype(f32)
    w1t = jnp.transpose(params["w1"]).astype(bf16)      # (E, H)
    b1 = params["b1"].reshape(1, H).astype(f32)
    w2t = jnp.transpose(params["w2"]).astype(bf16)      # (H, E)
    b2 = params["b2"].reshape(1, E).astype(f32)
    ln1w = params["ln1_w"].reshape(1, E).astype(f32)
    ln1b = params["ln1_b"].reshape(1, E).astype(f32)
    ln2w = params["ln2_w"].reshape(1, E).astype(f32)
    ln2b = params["ln2_b"].reshape(1, E).astype(f32)

    args = (x_bse, ln1w, ln1b, wqkv, bqkv, wo, bo,
            ln2w, ln2b, w1t, b1, w2t, b2)

    def const_spec(a):
        return pl.BlockSpec(a.shape, lambda b, n=a.ndim: (0,) * n)

    in_specs = ([pl.BlockSpec((None, S, E), lambda b: (b, 0, 0))] +
                [const_spec(a) for a in args[1:]])

    kernel = functools.partial(_transformer_block_kernel,
                               num_heads=num_heads, head_dim=head_dim)

    out_bse = pl.pallas_call(
        kernel,
        out_shape=jax.ShapeDtypeStruct((B, S, E), x_sbe.dtype),
        grid_spec=pltpu.PrefetchScalarGridSpec(
            num_scalar_prefetch=0,
            grid=(B,),
            in_specs=in_specs,
            out_specs=pl.BlockSpec((None, S, E), lambda b: (b, 0, 0)),
        ),
        compiler_params=pltpu.CompilerParams(
            dimension_semantics=("parallel",),
            vmem_limit_bytes=32 * 1024 * 1024,
        ),
    )(*args)

    return jnp.transpose(out_bse, (1, 0, 2))  # back to (S, B, E)


def _reference(x_sbe, params, *, num_heads):
    """Pure-JAX f32 reference of the PyTorch forward, for a tolerance check."""
    S, B, E = x_sbe.shape
    hd = E // num_heads

    def ln(t, w, b):
        mu = t.mean(-1, keepdims=True)
        var = ((t - mu) ** 2).mean(-1, keepdims=True)
        return (t - mu) * jax.lax.rsqrt(var + EPS) * w + b

    x = x_sbe
    xn = ln(x, params["ln1_w"], params["ln1_b"])
    qkv = xn @ params["in_proj_w"].T + params["in_proj_b"]     # (S, B, 3E)
    q, k, v = jnp.split(qkv, 3, axis=-1)

    def heads(t):  # (S, B, E) -> (B, nh, S, hd)
        return t.reshape(S, B, num_heads, hd).transpose(1, 2, 0, 3)

    qh, kh, vh = heads(q), heads(k), heads(v)
    s = (qh / math.sqrt(hd)) @ kh.transpose(0, 1, 3, 2)
    p = jax.nn.softmax(s, axis=-1)
    ctx = (p @ vh).transpose(2, 0, 1, 3).reshape(S, B, E)
    attn = ctx @ params["out_proj_w"].T + params["out_proj_b"]
    x1 = x + attn
    xn2 = ln(x1, params["ln2_w"], params["ln2_b"])
    h1 = xn2 @ params["w1"].T + params["b1"]
    g = 0.5 * h1 * (1.0 + jax.lax.erf(h1 / math.sqrt(2.0)))
    h2 = g @ params["w2"].T + params["b2"]
    return x1 + h2


def init_params(key, embed_dim, num_heads, mlp_ratio=4.0):
    E = embed_dim
    H = int(E * mlp_ratio)
    ks = jax.random.split(key, 8)
    scale = 0.02
    return {
        "ln1_w": jnp.ones((E,), jnp.float32),
        "ln1_b": jnp.zeros((E,), jnp.float32),
        "in_proj_w": scale * jax.random.normal(ks[0], (3 * E, E), jnp.float32),
        "in_proj_b": scale * jax.random.normal(ks[1], (3 * E,), jnp.float32),
        "out_proj_w": scale * jax.random.normal(ks[2], (E, E), jnp.float32),
        "out_proj_b": scale * jax.random.normal(ks[3], (E,), jnp.float32),
        "ln2_w": jnp.ones((E,), jnp.float32),
        "ln2_b": jnp.zeros((E,), jnp.float32),
        "w1": scale * jax.random.normal(ks[4], (H, E), jnp.float32),
        "b1": scale * jax.random.normal(ks[5], (H,), jnp.float32),
        "w2": scale * jax.random.normal(ks[6], (E, H), jnp.float32),
        "b2": scale * jax.random.normal(ks[7], (E,), jnp.float32),
    }


if __name__ == "__main__":
    # Small shapes: seq=8, batch=2, embed_dim=32, num_heads=4, mlp hidden=128
    S, B, E, NH = 8, 2, 32, 4
    key = jax.random.PRNGKey(0)
    kx, kp = jax.random.split(key)
    x = jax.random.normal(kx, (S, B, E), jnp.float32)  # (seq, batch, embed) torch layout
    params = init_params(kp, E, NH)

    out = transformer_block(x, params, num_heads=NH)
    jax.block_until_ready(out)
    assert out.shape == (S, B, E)

    ref = _reference(x, params, num_heads=NH)
    err = float(jnp.max(jnp.abs(out - ref)))
    assert err < 5e-2, f"max abs error too large: {err}"
    print("KERNEL_OK")
</pallas_src>

<mosaic_0001>
module attributes {stable_mosaic.version = 11 : i64} {
  func.func @_transformer_block_kernel(%arg0: i32, %arg1: memref<1x8x32xf32, #tpu.memory_space<vmem>>, %arg2: memref<1x32xf32, #tpu.memory_space<vmem>>, %arg3: memref<1x32xf32, #tpu.memory_space<vmem>>, %arg4: memref<4x32x24xbf16, #tpu.memory_space<vmem>>, %arg5: memref<4x1x24xf32, #tpu.memory_space<vmem>>, %arg6: memref<4x8x32xbf16, #tpu.memory_space<vmem>>, %arg7: memref<1x32xf32, #tpu.memory_space<vmem>>, %arg8: memref<1x32xf32, #tpu.memory_space<vmem>>, %arg9: memref<1x32xf32, #tpu.memory_space<vmem>>, %arg10: memref<32x128xbf16, #tpu.memory_space<vmem>>, %arg11: memref<1x128xf32, #tpu.memory_space<vmem>>, %arg12: memref<128x32xbf16, #tpu.memory_space<vmem>>, %arg13: memref<1x32xf32, #tpu.memory_space<vmem>>, %arg14: memref<1x8x32xf32, #tpu.memory_space<vmem>>) attributes {dimension_semantics = [#tpu.dimension_semantics<parallel>], iteration_bounds = array<i64: 2>, scalar_prefetch = 0 : i64, scratch_operands = 0 : i64, tpu.core_type = #tpu.core_type<tc>, window_params = [{transform_indices = @transform_0, window_bounds = array<i64: 1, 8, 32>}, {pipeline_mode = #tpu.pipeline_mode<synchronous>, transform_indices = @transform_1, window_bounds = array<i64: 1, 32>}, {pipeline_mode = #tpu.pipeline_mode<synchronous>, transform_indices = @transform_2, window_bounds = array<i64: 1, 32>}, {pipeline_mode = #tpu.pipeline_mode<synchronous>, transform_indices = @transform_3, window_bounds = array<i64: 4, 32, 24>}, {pipeline_mode = #tpu.pipeline_mode<synchronous>, transform_indices = @transform_4, window_bounds = array<i64: 4, 1, 24>}, {pipeline_mode = #tpu.pipeline_mode<synchronous>, transform_indices = @transform_5, window_bounds = array<i64: 4, 8, 32>}, {pipeline_mode = #tpu.pipeline_mode<synchronous>, transform_indices = @transform_6, window_bounds = array<i64: 1, 32>}, {pipeline_mode = #tpu.pipeline_mode<synchronous>, transform_indices = @transform_7, window_bounds = array<i64: 1, 32>}, {pipeline_mode = #tpu.pipeline_mode<synchronous>, transform_indices = @transform_8, window_bounds = array<i64: 1, 32>}, {pipeline_mode = #tpu.pipeline_mode<synchronous>, transform_indices = @transform_9, window_bounds = array<i64: 32, 128>}, {pipeline_mode = #tpu.pipeline_mode<synchronous>, transform_indices = @transform_10, window_bounds = array<i64: 1, 128>}, {pipeline_mode = #tpu.pipeline_mode<synchronous>, transform_indices = @transform_11, window_bounds = array<i64: 128, 32>}, {pipeline_mode = #tpu.pipeline_mode<synchronous>, transform_indices = @transform_12, window_bounds = array<i64: 1, 32>}, {transform_indices = @transform_13, window_bounds = array<i64: 1, 8, 32>}]} {
    %c0 = arith.constant 0 : index
    %c0_0 = arith.constant 0 : index
    %c0_1 = arith.constant 0 : index
    %0 = vector.load %arg1[%c0, %c0_0, %c0_1] : memref<1x8x32xf32, #tpu.memory_space<vmem>>, vector<1x8x32xf32>
    %1 = vector.shape_cast %0 : vector<1x8x32xf32> to vector<8x32xf32>
    %c0_2 = arith.constant 0 : index
    %c0_3 = arith.constant 0 : index
    %2 = vector.load %arg2[%c0_2, %c0_3] : memref<1x32xf32, #tpu.memory_space<vmem>>, vector<1x32xf32>
    %c0_4 = arith.constant 0 : index
    %c0_5 = arith.constant 0 : index
    %3 = vector.load %arg3[%c0_4, %c0_5] : memref<1x32xf32, #tpu.memory_space<vmem>>, vector<1x32xf32>
    %cst = arith.constant dense<0.000000e+00> : vector<8xf32>
    %4 = vector.multi_reduction <add>, %1, %cst [1] : vector<8x32xf32> to vector<8xf32>
    %5 = vector.shape_cast %4 : vector<8xf32> to vector<8x1xf32>
    %cst_6 = arith.constant 3.200000e+01 : f32
    %6 = vector.broadcast %cst_6 : f32 to vector<8x1xf32>
    %7 = arith.divf %5, %6 : vector<8x1xf32>
    %8 = vector.broadcast %7 : vector<8x1xf32> to vector<8x32xf32>
    %9 = arith.subf %1, %8 : vector<8x32xf32>
    %10 = arith.mulf %9, %9 : vector<8x32xf32>
    %cst_7 = arith.constant dense<0.000000e+00> : vector<8xf32>
    %11 = vector.multi_reduction <add>, %10, %cst_7 [1] : vector<8x32xf32> to vector<8xf32>
    %12 = vector.shape_cast %11 : vector<8xf32> to vector<8x1xf32>
    %cst_8 = arith.constant 3.200000e+01 : f32
    %13 = vector.broadcast %cst_8 : f32 to vector<8x1xf32>
    %14 = arith.divf %12, %13 : vector<8x1xf32>
    %15 = vector.broadcast %7 : vector<8x1xf32> to vector<8x32xf32>
    %16 = arith.subf %1, %15 : vector<8x32xf32>
    %cst_9 = arith.constant 9.99999974E-6 : f32
    %17 = vector.broadcast %cst_9 : f32 to vector<8x1xf32>
    %18 = arith.addf %14, %17 : vector<8x1xf32>
    %19 = math.rsqrt %18 : vector<8x1xf32>
    %20 = vector.broadcast %19 : vector<8x1xf32> to vector<8x32xf32>
    %21 = arith.mulf %16, %20 : vector<8x32xf32>
    %22 = vector.broadcast %2 : vector<1x32xf32> to vector<8x32xf32>
    %23 = arith.mulf %21, %22 : vector<8x32xf32>
    %24 = vector.broadcast %3 : vector<1x32xf32> to vector<8x32xf32>
    %25 = arith.addf %23, %24 : vector<8x32xf32>
    %26 = arith.truncf %25 : vector<8x32xf32> to vector<8x32xbf16>
    %27 = vector.shape_cast %26 : vector<8x32xbf16> to vector<1x8x32xbf16>
    %28 = vector.shape_cast %27 : vector<1x8x32xbf16> to vector<1x8x32xbf16>
    %29 = vector.broadcast %28 : vector<1x8x32xbf16> to vector<4x8x32xbf16>
    %c0_10 = arith.constant 0 : index
    %c0_11 = arith.constant 0 : index
    %c0_12 = arith.constant 0 : index
    %30 = vector.load %arg4[%c0_10, %c0_11, %c0_12] : memref<4x32x24xbf16, #tpu.memory_space<vmem>>, vector<4x32x24xbf16>
    "tpu.trace_start"() <{level = 10 : i32, message = "hse,hed->hsd"}> : () -> ()
    %cst_13 = arith.constant dense<0.000000e+00> : vector<4x8x24xf32>
    %31 = tpu.matmul %29, %30, %cst_13 {dimension_numbers = #tpu.dot_dimension_numbers<[2], [1], [1], [2], [0, 0, 0, 1, 1, 2], [0], [0]>} : vector<4x8x32xbf16>, vector<4x32x24xbf16>, vector<4x8x24xf32> -> vector<4x8x24xf32>
    "tpu.trace_stop"() : () -> ()
    %c0_14 = arith.constant 0 : index
    %c0_15 = arith.constant 0 : index
    %c0_16 = arith.constant 0 : index
    %32 = vector.load %arg5[%c0_14, %c0_15, %c0_16] : memref<4x1x24xf32, #tpu.memory_space<vmem>>, vector<4x1x24xf32>
    %33 = vector.broadcast %32 : vector<4x1x24xf32> to vector<4x8x24xf32>
    %34 = arith.addf %31, %33 : vector<4x8x24xf32>
    %35 = vector.extract_strided_slice %34 {offsets = [0, 0, 0], sizes = [4, 8, 8], strides = [1, 1, 1]} : vector<4x8x24xf32> to vector<4x8x8xf32>
    %cst_17 = arith.constant 0.353553385 : f32
    %36 = vector.broadcast %cst_17 : f32 to vector<4x8x8xf32>
    %37 = arith.mulf %35, %36 : vector<4x8x8xf32>
    %38 = arith.truncf %37 : vector<4x8x8xf32> to vector<4x8x8xbf16>
    %39 = vector.extract_strided_slice %34 {offsets = [0, 0, 8], sizes = [4, 8, 8], strides = [1, 1, 1]} : vector<4x8x24xf32> to vector<4x8x8xf32>
    %40 = arith.truncf %39 : vector<4x8x8xf32> to vector<4x8x8xbf16>
    %41 = vector.extract_strided_slice %34 {offsets = [0, 0, 16], sizes = [4, 8, 8], strides = [1, 1, 1]} : vector<4x8x24xf32> to vector<4x8x8xf32>
    %42 = arith.truncf %41 : vector<4x8x8xf32> to vector<4x8x8xbf16>
    "tpu.trace_start"() <{level = 10 : i32, message = "hqd,hkd->hqk"}> : () -> ()
    %cst_18 = arith.constant dense<0.000000e+00> : vector<4x8x8xf32>
    %43 = tpu.matmul %38, %40, %cst_18 {dimension_numbers = #tpu.dot_dimension_numbers<[2], [2], [1], [1], [0, 0, 0, 1, 1, 1], [0], [0]>} : vector<4x8x8xbf16>, vector<4x8x8xbf16>, vector<4x8x8xf32> -> vector<4x8x8xf32>
    "tpu.trace_stop"() : () -> ()
    %cst_19 = arith.constant dense<0xFF800000> : vector<4x8xf32>
    %44 = vector.multi_reduction <maximumf>, %43, %cst_19 [2] : vector<4x8x8xf32> to vector<4x8xf32>
    %45 = vector.shape_cast %44 : vector<4x8xf32> to vector<4x8x1xf32>
    %46 = vector.broadcast %45 : vector<4x8x1xf32> to vector<4x8x8xf32>
    %47 = arith.subf %43, %46 : vector<4x8x8xf32>
    %48 = math.exp %47 : vector<4x8x8xf32>
    %cst_20 = arith.constant dense<0.000000e+00> : vector<4x8xf32>
    %49 = vector.multi_reduction <add>, %48, %cst_20 [2] : vector<4x8x8xf32> to vector<4x8xf32>
    %50 = vector.shape_cast %49 : vector<4x8xf32> to vector<4x8x1xf32>
    %51 = tpu.reciprocal %50 {approx = true} : vector<4x8x1xf32> -> vector<4x8x1xf32>
    %52 = vector.broadcast %51 : vector<4x8x1xf32> to vector<4x8x8xf32>
    %53 = arith.mulf %48, %52 : vector<4x8x8xf32>
    %54 = arith.truncf %53 : vector<4x8x8xf32> to vector<4x8x8xbf16>
    "tpu.trace_start"() <{level = 10 : i32, message = "hqk,hkd->hqd"}> : () -> ()
    %cst_21 = arith.constant dense<0.000000e+00> : vector<4x8x8xf32>
    %55 = tpu.matmul %54, %42, %cst_21 {dimension_numbers = #tpu.dot_dimension_numbers<[2], [1], [1], [2], [0, 0, 0, 1, 1, 2], [0], [0]>} : vector<4x8x8xbf16>, vector<4x8x8xbf16>, vector<4x8x8xf32> -> vector<4x8x8xf32>
    "tpu.trace_stop"() : () -> ()
    %56 = arith.truncf %55 : vector<4x8x8xf32> to vector<4x8x8xbf16>
    %c0_22 = arith.constant 0 : index
    %c0_23 = arith.constant 0 : index
    %c0_24 = arith.constant 0 : index
    %57 = vector.load %arg6[%c0_22, %c0_23, %c0_24] : memref<4x8x32xbf16, #tpu.memory_space<vmem>>, vector<4x8x32xbf16>
    "tpu.trace_start"() <{level = 10 : i32, message = "hqd,hde->hqe"}> : () -> ()
    %cst_25 = arith.constant dense<0.000000e+00> : vector<4x8x32xf32>
    %58 = tpu.matmul %56, %57, %cst_25 {dimension_numbers = #tpu.dot_dimension_numbers<[2], [1], [1], [2], [0, 0, 0, 1, 1, 2], [0], [0]>} : vector<4x8x8xbf16>, vector<4x8x32xbf16>, vector<4x8x32xf32> -> vector<4x8x32xf32>
    "tpu.trace_stop"() : () -> ()
    %cst_26 = arith.constant dense<0.000000e+00> : vector<8x32xf32>
    %59 = vector.multi_reduction <add>, %58, %cst_26 [0] : vector<4x8x32xf32> to vector<8x32xf32>
    %c0_27 = arith.constant 0 : index
    %c0_28 = arith.constant 0 : index
    %60 = vector.load %arg7[%c0_27, %c0_28] : memref<1x32xf32, #tpu.memory_space<vmem>>, vector<1x32xf32>
    %61 = vector.broadcast %60 : vector<1x32xf32> to vector<8x32xf32>
    %62 = arith.addf %59, %61 : vector<8x32xf32>
    %63 = arith.addf %1, %62 : vector<8x32xf32>
    %c0_29 = arith.constant 0 : index
    %c0_30 = arith.constant 0 : index
    %64 = vector.load %arg8[%c0_29, %c0_30] : memref<1x32xf32, #tpu.memory_space<vmem>>, vector<1x32xf32>
    %c0_31 = arith.constant 0 : index
    %c0_32 = arith.constant 0 : index
    %65 = vector.load %arg9[%c0_31, %c0_32] : memref<1x32xf32, #tpu.memory_space<vmem>>, vector<1x32xf32>
    %cst_33 = arith.constant dense<0.000000e+00> : vector<8xf32>
    %66 = vector.multi_reduction <add>, %63, %cst_33 [1] : vector<8x32xf32> to vector<8xf32>
    %67 = vector.shape_cast %66 : vector<8xf32> to vector<8x1xf32>
    %cst_34 = arith.constant 3.200000e+01 : f32
    %68 = vector.broadcast %cst_34 : f32 to vector<8x1xf32>
    %69 = arith.divf %67, %68 : vector<8x1xf32>
    %70 = vector.broadcast %69 : vector<8x1xf32> to vector<8x32xf32>
    %71 = arith.subf %63, %70 : vector<8x32xf32>
    %72 = arith.mulf %71, %71 : vector<8x32xf32>
    %cst_35 = arith.constant dense<0.000000e+00> : vector<8xf32>
    %73 = vector.multi_reduction <add>, %72, %cst_35 [1] : vector<8x32xf32> to vector<8xf32>
    %74 = vector.shape_cast %73 : vector<8xf32> to vector<8x1xf32>
    %cst_36 = arith.constant 3.200000e+01 : f32
    %75 = vector.broadcast %cst_36 : f32 to vector<8x1xf32>
    %76 = arith.divf %74, %75 : vector<8x1xf32>
    %77 = vector.broadcast %69 : vector<8x1xf32> to vector<8x32xf32>
    %78 = arith.subf %63, %77 : vector<8x32xf32>
    %cst_37 = arith.constant 9.99999974E-6 : f32
    %79 = vector.broadcast %cst_37 : f32 to vector<8x1xf32>
    %80 = arith.addf %76, %79 : vector<8x1xf32>
    %81 = math.rsqrt %80 : vector<8x1xf32>
    %82 = vector.broadcast %81 : vector<8x1xf32> to vector<8x32xf32>
    %83 = arith.mulf %78, %82 : vector<8x32xf32>
    %84 = vector.broadcast %64 : vector<1x32xf32> to vector<8x32xf32>
    %85 = arith.mulf %83, %84 : vector<8x32xf32>
    %86 = vector.broadcast %65 : vector<1x32xf32> to vector<8x32xf32>
    %87 = arith.addf %85, %86 : vector<8x32xf32>
    %88 = arith.truncf %87 : vector<8x32xf32> to vector<8x32xbf16>
    %c0_38 = arith.constant 0 : index
    %c0_39 = arith.constant 0 : index
    %89 = vector.load %arg10[%c0_38, %c0_39] : memref<32x128xbf16, #tpu.memory_space<vmem>>, vector<32x128xbf16>
    %cst_40 = arith.constant dense<0.000000e+00> : vector<8x128xf32>
    %90 = tpu.matmul %88, %89, %cst_40 {dimension_numbers = #tpu.dot_dimension_numbers<[1], [0], [0], [1], [0, 0, 1, 1], [], []>} : vector<8x32xbf16>, vector<32x128xbf16>, vector<8x128xf32> -> vector<8x128xf32>
    %c0_41 = arith.constant 0 : index
    %c0_42 = arith.constant 0 : index
    %91 = vector.load %arg11[%c0_41, %c0_42] : memref<1x128xf32, #tpu.memory_space<vmem>>, vector<1x128xf32>
    %92 = vector.broadcast %91 : vector<1x128xf32> to vector<8x128xf32>
    %93 = arith.addf %90, %92 : vector<8x128xf32>
    %cst_43 = arith.constant 5.000000e-01 : f32
    %94 = vector.broadcast %cst_43 : f32 to vector<8x128xf32>
    %95 = arith.mulf %94, %93 : vector<8x128xf32>
    %cst_44 = arith.constant 0.707106769 : f32
    %96 = vector.broadcast %cst_44 : f32 to vector<8x128xf32>
    %97 = arith.mulf %93, %96 : vector<8x128xf32>
    %98 = math.erf %97 : vector<8x128xf32>
    %cst_45 = arith.constant 1.000000e+00 : f32
    %99 = vector.broadcast %cst_45 : f32 to vector<8x128xf32>
    %100 = arith.addf %99, %98 : vector<8x128xf32>
    %101 = arith.mulf %95, %100 : vector<8x128xf32>
    %102 = arith.truncf %101 : vector<8x128xf32> to vector<8x128xbf16>
    %c0_46 = arith.constant 0 : index
    %c0_47 = arith.constant 0 : index
    %103 = vector.load %arg12[%c0_46, %c0_47] : memref<128x32xbf16, #tpu.memory_space<vmem>>, vector<128x32xbf16>
    %cst_48 = arith.constant dense<0.000000e+00> : vector<8x32xf32>
    %104 = tpu.matmul %102, %103, %cst_48 {dimension_numbers = #tpu.dot_dimension_numbers<[1], [0], [0], [1], [0, 0, 1, 1], [], []>} : vector<8x128xbf16>, vector<128x32xbf16>, vector<8x32xf32> -> vector<8x32xf32>
    %c0_49 = arith.constant 0 : index
    %c0_50 = arith.constant 0 : index
    %105 = vector.load %arg13[%c0_49, %c0_50] : memref<1x32xf32, #tpu.memory_space<vmem>>, vector<1x32xf32>
    %106 = vector.broadcast %105 : vector<1x32xf32> to vector<8x32xf32>
    %107 = arith.addf %104, %106 : vector<8x32xf32>
    %108 = arith.addf %63, %107 : vector<8x32xf32>
    %c0_51 = arith.constant 0 : index
    %c0_52 = arith.constant 0 : index
    %c0_53 = arith.constant 0 : index
    %109 = vector.load %arg14[%c0_51, %c0_52, %c0_53] : memref<1x8x32xf32, #tpu.memory_space<vmem>>, vector<1x8x32xf32>
    %110 = vector.shape_cast %109 : vector<1x8x32xf32> to vector<8x32xf32>
    %111 = vector.shape_cast %108 : vector<8x32xf32> to vector<1x8x32xf32>
    tpu.vector_store %arg14[%c0_51, %c0_52, %c0_53], %111 {strides = array<i32>} : memref<1x8x32xf32, #tpu.memory_space<vmem>>, vector<1x8x32xf32>,
    return
  }
  func.func @transform_0(%arg0: i32) -> (i32, i32, i32) {
    %c0_i32 = arith.constant 0 : i32
    %c0_i32_0 = arith.constant 0 : i32
    %c0_i32_1 = arith.constant 0 : i32
    return %arg0, %c0_i32, %c0_i32_0 : i32, i32, i32
  }
  func.func @transform_1(%arg0: i32) -> (i32, i32) {
    %c0_i32 = arith.constant 0 : i32
    %c0_i32_0 = arith.constant 0 : i32
    %c0_i32_1 = arith.constant 0 : i32
    return %c0_i32, %c0_i32_0 : i32, i32
  }
  func.func @transform_2(%arg0: i32) -> (i32, i32) {
    %c0_i32 = arith.constant 0 : i32
    %c0_i32_0 = arith.constant 0 : i32
    %c0_i32_1 = arith.constant 0 : i32
    return %c0_i32, %c0_i32_0 : i32, i32
  }
  func.func @transform_3(%arg0: i32) -> (i32, i32, i32) {
    %c0_i32 = arith.constant 0 : i32
    %c0_i32_0 = arith.constant 0 : i32
    %c0_i32_1 = arith.constant 0 : i32
    %c0_i32_2 = arith.constant 0 : i32
    return %c0_i32, %c0_i32_0, %c0_i32_1 : i32, i32, i32
  }
  func.func @transform_4(%arg0: i32) -> (i32, i32, i32) {
    %c0_i32 = arith.constant 0 : i32
    %c0_i32_0 = arith.constant 0 : i32
    %c0_i32_1 = arith.constant 0 : i32
    %c0_i32_2 = arith.constant 0 : i32
    return %c0_i32, %c0_i32_0, %c0_i32_1 : i32, i32, i32
  }
  func.func @transform_5(%arg0: i32) -> (i32, i32, i32) {
    %c0_i32 = arith.constant 0 : i32
    %c0_i32_0 = arith.constant 0 : i32
    %c0_i32_1 = arith.constant 0 : i32
    %c0_i32_2 = arith.constant 0 : i32
    return %c0_i32, %c0_i32_0, %c0_i32_1 : i32, i32, i32
  }
  func.func @transform_6(%arg0: i32) -> (i32, i32) {
    %c0_i32 = arith.constant 0 : i32
    %c0_i32_0 = arith.constant 0 : i32
    %c0_i32_1 = arith.constant 0 : i32
    return %c0_i32, %c0_i32_0 : i32, i32
  }
  func.func @transform_7(%arg0: i32) -> (i32, i32) {
    %c0_i32 = arith.constant 0 : i32
    %c0_i32_0 = arith.constant 0 : i32
    %c0_i32_1 = arith.constant 0 : i32
    return %c0_i32, %c0_i32_0 : i32, i32
  }
  func.func @transform_8(%arg0: i32) -> (i32, i32) {
    %c0_i32 = arith.constant 0 : i32
    %c0_i32_0 = arith.constant 0 : i32
    %c0_i32_1 = arith.constant 0 : i32
    return %c0_i32, %c0_i32_0 : i32, i32
  }
  func.func @transform_9(%arg0: i32) -> (i32, i32) {
    %c0_i32 = arith.constant 0 : i32
    %c0_i32_0 = arith.constant 0 : i32
    %c0_i32_1 = arith.constant 0 : i32
    return %c0_i32, %c0_i32_0 : i32, i32
  }
  func.func @transform_10(%arg0: i32) -> (i32, i32) {
    %c0_i32 = arith.constant 0 : i32
    %c0_i32_0 = arith.constant 0 : i32
    %c0_i32_1 = arith.constant 0 : i32
    return %c0_i32, %c0_i32_0 : i32, i32
  }
  func.func @transform_11(%arg0: i32) -> (i32, i32) {
    %c0_i32 = arith.constant 0 : i32
    %c0_i32_0 = arith.constant 0 : i32
    %c0_i32_1 = arith.constant 0 : i32
    return %c0_i32, %c0_i32_0 : i32, i32
  }
  func.func @transform_12(%arg0: i32) -> (i32, i32) {
    %c0_i32 = arith.constant 0 : i32
    %c0_i32_0 = arith.constant 0 : i32
    %c0_i32_1 = arith.constant 0 : i32
    return %c0_i32, %c0_i32_0 : i32, i32
  }
  func.func @transform_13(%arg0: i32) -> (i32, i32, i32) {
    %c0_i32 = arith.constant 0 : i32
    %c0_i32_0 = arith.constant 0 : i32
    %c0_i32_1 = arith.constant 0 : i32
    return %arg0, %c0_i32, %c0_i32_0 : i32, i32, i32
  }
}

</mosaic_0001>

<bundles_post_ra>
// kernel: tpu_custom_call.1
= control target key start
LH: loop header
LB: loop body
LE: loop exit
PB: predicated region body
PF: predicated region fallthrough
CT: control target
= control target key end

     0   :  { %s1815_s0 = inlined_call_operand.vmem [shape: f32[2,8,32], index: 0, kind: input, shape index: {}]   ;;  %s1816_s1 = inlined_call_operand.vmem [shape: f32[1,32], index: 1, kind: input, shape index: {}]   ;;  %s1817_s2 = inlined_call_operand.vmem [shape: f32[1,32], index: 2, kind: input, shape index: {}]   ;;  %s1818_s3 = inlined_call_operand.vmem [shape: bf16[4,32,24], index: 3, kind: input, shape index: {}]   ;;  %s1819_s4 = inlined_call_operand.vmem [shape: f32[4,1,24], index: 4, kind: input, shape index: {}]   ;;  %s1820_s5 = inlined_call_operand.vmem [shape: bf16[4,8,32], index: 5, kind: input, shape index: {}]   ;;  %s1821_s6 = inlined_call_operand.vmem [shape: f32[1,32], index: 6, kind: input, shape index: {}]   ;;  %s1822_s7 = inlined_call_operand.vmem [shape: f32[1,32], index: 7, kind: input, shape index: {}]   ;;  %s1823_s8 = inlined_call_operand.vmem [shape: f32[1,32], index: 8, kind: input, shape index: {}]   ;;  %s1824_s9 = inlined_call_operand.vmem [shape: bf16[32,128], index: 9, kind: input, shape index: {}]   ;;  %s1825_s10 = inlined_call_operand.vmem [shape: f32[1,128], index: 10, kind: input, shape index: {}]   ;;  %s1826_s11 = inlined_call_operand.vmem [shape: bf16[128,32], index: 11, kind: input, shape index: {}]   ;;  %s1827_s12 = inlined_call_operand.vmem [shape: f32[1,32], index: 12, kind: input, shape index: {}]   ;;  %s1828_s13 = inlined_call_operand.hbm [shape: f32[2,8,32], index: 13, kind: output, shape index: {}]  }
   0x1   :  { %1829 = sst [smem:[#allocation6_spill]] %s1815_s0 }
   0x2   :  { %1830 = sst [smem:[#allocation7_spill]] %s1816_s1 }
   0x3   :  { %1831 = sst [smem:[#allocation8_spill]] %s1817_s2 }
   0x4   :  { %18 = vsyncpa [#allocation3], 0 }
   0x5   :  { %20 = vsyncpa [#allocation3 + $0x1], 0  ;;  %s1557_s25 = smov 0   ;;  %s1559_s26 = smov 0  }
   0x6   :  { %s1561_s27 = smov 0   ;;  %s1563_s28 = smov 0  }
   0x7 LB: > { %s1578_s29 = sadd.s32 4294967295, %s1482_s28   ;;  %s1225_s30 = sadd.s32 4294967294, %s1482_s28   ;;  %s1482_s28 = sphi %s1563_s28, %s1842_s28   ;;  %s1478_s27 = sphi %s1561_s27, %s1841_s27   ;;  %s1474_s26 = sphi %s1559_s26, %s1840_s26   ;;  %s1470_s25 = sphi %s1557_s25, %s1839_s25  }
   0x8   : > { %s1582_s14 = sadd.s32 1, %s1482_s28   ;;  %s311_s15 = sadd.s32 1, %s1478_s27 }
   0x9   : > { %s308_s16 = ssub.s32 %s1482_s28, %s1582_s14  ;;  %p321_p0 = scmp.ne.s32.totalorder %s1478_s27, %s1474_s26 }
   0xa   : > { %p309_p1 = scmp.eq.s32.totalorder %s308_s16, 0  ;;  %p322_p2 = scmp.eq.s32.totalorder %s1578_s29, 1 }
   0xb   : > { %p327_p3 = scmp.ne.s32.totalorder %s1474_s26, %s1470_s25  ;;  %p328_p4 = scmp.eq.s32.totalorder %s1225_s30, 1 }
   0xc   : > { %s1593_s17 = scalar_select %p309_p1, %s1478_s27, %s311_s15  }
   0xd   : > { %p1595_p5 = por %p322_p2, %p321_p0  ;;  %p1599_p6 = por %p328_p4, %p327_p3 }
   0xe   : > { %1832 = sst [smem:[#allocation5_spill]] %s1593_s17  ;;  %p1228_p7 = scmp.ge.s32.totalorder %s1482_s28, 1 }
   0xf   : > { %p389_p8 = scmp.lt.s32.totalorder %s1482_s28, 3 }
  0x11   : > { %p390_p9 = pnand %p1228_p7, %p389_p8 }
  0x12   : > { %p432_p10 = scmp.lt.s32.totalorder (!%p390_p9), %s1578_s29, 1  ;;  %s1835_s0 = sld [smem:[#allocation6_spill]] (!%p390_p9) }
  0x13   : > { %393 = sbr.rel (%p390_p9) target bundleno = 1844 (0x734), region = 72  ;;  %s1836_s1 = sld [smem:[#allocation7_spill]] (!%p390_p9) }
  0x14   : > { %s1837_s2 = sld [smem:[#allocation8_spill]] (!%p390_p9)  ;;  %s1322_s23 = sshll.u32 (!%p390_p9), %s1578_s29, 3 }
  0x18   : > { %s433_s20 = scalar_select %p432_p10, %s1578_s29, 1  ;;  %vm440_vm0 = vcmask 261120   ;;  %v1484_v2 = vmov 32.0   ;;  %v1326_v14 = vld [vmem:[%s1818_s3 + $0x8] sm:$0xff]  ;;  %v1328_v15 = vld [vmem:[%s1818_s3 + $0x18] sm:$0xff]  ;;  %v1325_v17 = vld [vmem:[%s1818_s3] sm:$0xff] }
  0x19   : > { %1396 = vrcp.f32 %v1484_v2  ;;  %v1332_v16 = vld [vmem:[%s1818_s3 + $0x38] sm:$0xff]  ;;  %532 = vmatpush.bf16.msra.mxu0 %v1326_v14  ;;  %557 = vmatpush.bf16.msra.mxu2 %v1328_v15  ;;  %v1327_v18 = vld [vmem:[%s1818_s3 + $0x10] sm:$0xff]  ;;  %v1330_v21 = vld [vmem:[%s1818_s3 + $0x28] sm:$0xff]  ;;  %vm631_vm5 = vcmask 64512   ;;  %vm776_vm6 = vcmask 1043456  }
  0x1a   : > { %s1230_s21 = sshll.u32 %s433_s20, 3  ;;  %607 = vmatpush.bf16.msra.mxu3 %v1332_v16  ;;  %v1331_v19 = vld [vmem:[%s1818_s3 + $0x30] sm:$0xff]  ;;  %v1329_v23 = vld [vmem:[%s1818_s3 + $0x20] sm:$0xff]  ;;  %s1161_s20 = scalar_lea.hbm %s1828_s13, %s1322_s23 }
  0x1b   : > { %s435_s24 = scalar_lea.vmem %s1835_s0, %s1230_s21  ;;  %v1385_v31 = vld [vmem:[%s1836_s1] ss:$0 sm:$0xff]  ;;  %v1388_v41 = vld [vmem:[%s1819_s4 + $0x1] ss:$0 sm:$0xff]  ;;  %s1485_s21 = smov 120  }
  0x1c   : > { %v1610_v0 = vld [vmem:[%s435_s24] sm:$0xff]  ;;  %s1486_s24 = smov 112   ;;  %s429_s0 = sand.u32 1, %s1474_s26  }
  0x1d   : > { %v441_v1 = vsel %vm440_vm0, %v1610_v0, 0.0  ;;  %533 = vmatpush.bf16.msra.mxu0 %v1325_v17  ;;  %558 = vmatpush.bf16.msra.mxu2 %v1327_v18  ;;  %v1386_v34 = vld [vmem:[%s1837_s2] ss:$0 sm:$0xff]  ;;  %v1390_v54 = vld [vmem:[%s1819_s4 + $0x2] ss:$0 sm:$0xff]  ;;  %s1229_s17 = sshll.u32 %s429_s0, 3 }
  0x1e   : > { %442 = vadd.xlane.f32.xlu0 %v441_v1  ;;  %608 = vmatpush.bf16.msra.mxu3 %v1331_v19  ;;  %v1387_v38 = vld [vmem:[%s1819_s4] ss:$0 sm:$0xff]  ;;  %v1389_v55 = vld [vmem:[%s1819_s4 + $0x3] ss:$0 sm:$0xff]  ;;  %s1165_s1 = sshll.u32 %s1161_s20, 4  ;;  %s1151_s29 = scalar_lea.sflag [#allocation3], %s429_s0  ;;  %s1166_s1 = int_to_ptr.hbm [resolvable:$true] %s1165_s1 }
  0x1f   : > { %v1397_v3 = vpop.eup %1396  ;;  %s1434_s2 = sshra.s32 %s1166_s1, 4  ;;  %s1435_s2 = int_to_ptr.hbm [resolvable:$true] %s1434_s2 }
  0x20   : > { %v445_v4 = vmul.f32 32.0, %v1397_v3  ;;  %vm449_vm1 = vweird.f32 %v1397_v3  ;;  %p1441_p0 = scmp.lt.s32.totalorder %s1435_s2, %s1828_s13 }
  0x21   : > { %582 = vmatpush.bf16.msrb.mxu2 %v1330_v21 }
  0x22   : > { %v446_v5 = vsub.f32 1.0, %v445_v4 }
  0x24   : > { %v447_v6 = vmul.f32 %v1397_v3, %v446_v5 }
  0x25   : > { %583 = vmatpush.bf16.msrb.mxu2 %v1329_v23 }
  0x26   : > { %v448_v7 = vadd.f32 %v1397_v3, %v447_v6 }
  0x28   : > { %v1614_v8 = vsel %vm449_vm1, %v1397_v3, %v448_v7 }
  0x91   : > { %v443_v9 = vpop.xlane.xlu0 %442 }
  0x92   : > { %v451_v10 = vmul.f32 %v1614_v8, %v443_v9 }
  0x94   : > { %v452_v11 = vsub.f32 %v1610_v0, %v451_v10 }
  0x96   : > { %v453_v12 = vmul.f32 %v452_v11, %v452_v11 }
  0x98   : > { %v454_v13 = vsel %vm440_vm0, %v453_v12, 0.0 }
  0x99   : > { %455 = vadd.xlane.f32.xlu0 %v454_v13 }
 0x10c   : > { %v456_v20 = vpop.xlane.xlu0 %455 }
 0x10d   : > { %v457_v22 = vmul.f32 %v456_v20, %v1614_v8 }
 0x10f   : > { %v458_v24 = vadd.f32 1e-05, %v457_v22 }
 0x111   : > { %1398 = vrsqrt.f32 %v458_v24  ;;  %vm465_vm3 = vweird.f32 %v458_v24 }
 0x117   : > { %v1399_v25 = vpop.eup %1398 }
 0x118   : > { %v460_v26 = vmul.f32 %v1399_v25, %v458_v24  ;;  %vm466_vm2 = vweird.f32 %v1399_v25 }
 0x119   : > { %vm467_vm4 = vmor %vm465_vm3, %vm466_vm2 }
 0x11a   : > { %v461_v27 = vmul.f32 %v1399_v25, %v460_v26 }
 0x11c   : > { %v462_v28 = vmul.f32 0.5, %v461_v27 }
 0x11e   : > { %v463_v29 = vsub.f32 1.5, %v462_v28 }
 0x120   : > { %v464_v30 = vmul.f32 %v1399_v25, %v463_v29 }
 0x122   : > { %v468_v32 = vsel %vm467_vm4, %v1399_v25, %v464_v30 }
 0x123   : > { %v469_v33 = vmul.f32 %v468_v32, %v452_v11 }
 0x125   : > { %v473_v35 = vmul.f32 %v1385_v31, %v469_v33 }
 0x127   : > { %v477_v36 = vadd.f32 %v1386_v34, %v473_v35 }
 0x129   : > { %v478_v37 = vpack.c.bf16 %v477_v36, %v477_v36 }
 0x12b   : > { %1239 = vmatmul.msk.bf16.vlgmr.msra.gmra.mxu0 %vm440_vm0, %v478_v37  ;;  %1248 = vmatmul.msk.bf16.vlgmr.msra.gmra.mxu2 %vm440_vm0, %v478_v37 }
 0x12c   : > { %1266 = vmatmul.msk.bf16.vlgmr.msra.gmra.mxu3 %vm440_vm0, %v478_v37 }
 0x13b   : > { %1257 = vmatmul.msk.bf16.vlgmr.msrb.gmra.mxu2 %vm440_vm0, %v478_v37 }
 0x1a8   : > { %v535_v39 = vpop.f32.mrf.mxu0 }
 0x1a9   : > { %v536_v40 = vadd.f32 %v1387_v38, %v535_v39 }
 0x1ab   : > { %v622_v42 = vpack.c.bf16 %v536_v40, %v536_v40  ;;  %v614_v5 = vmul.f32 0.35355338, %v536_v40 }
 0x1ad   : > { %v627_v43 = vunpack.c.l.b16 %v622_v42  ;;  %v618_v6 = vpack.c.bf16 %v614_v5, %v614_v5 }
 0x1ae   : > { %v560_v44 = vpop.f32.mrf.mxu2 }
 0x1af   : > { %v561_v45 = vadd.f32 %v1388_v41, %v560_v44  ;;  %v610_v46 = vpop.f32.mrf.mxu3  ;;  %v1660_v47 = vpack.c.b16 %v627_v43, %v627_v43 }
 0x1b0   : > { %v537_v48 = vpop.f32.mrf.mxu0  ;;  %v611_v58 = vadd.f32 %v1389_v55, %v610_v46 }
 0x1b1   : > { %v623_v49 = vpack.c.bf16 %v561_v45, %v561_v45  ;;  %629 = vrot.lane.b32.xlu2 %v1660_v47, %s1485_s21  ;;  %v615_v10 = vmul.f32 0.35355338, %v561_v45 }
 0x1b2   : > { %v625_v61 = vpack.c.bf16 %v611_v58, %v611_v58  ;;  %v617_v18 = vmul.f32 0.35355338, %v611_v58 }
 0x1b3   : > { %v652_v50 = vunpack.c.l.b16 %v623_v49  ;;  %v619_v11 = vpack.c.bf16 %v615_v10, %v615_v10 }
 0x1b4   : > { %v700_v1 = vunpack.c.l.b16 %v625_v61  ;;  %v621_v19 = vpack.c.bf16 %v617_v18, %v617_v18 }
 0x1b5   : > { %v1663_v52 = vpack.c.b16 %v652_v50, %v652_v50 }
 0x1b6   : > { %v562_v51 = vpop.f32.mrf.mxu2  ;;  %v701_v2 = vpack.c.b16 %v700_v1, %v700_v1 }
 0x1b7   : > { %v612_v53 = vpop.f32.mrf.mxu3 }
 0x1b9   : > { %654 = vrot.lane.b32.xlu2 %v1663_v52, %s1485_s21 }
 0x1be   : > { %v585_v56 = vpop.f32.mrf.mxu2 }
 0x1bf   : > { %v586_v57 = vadd.f32 %v1390_v54, %v585_v56 }
 0x1c1   : > { %v624_v59 = vpack.c.bf16 %v586_v57, %v586_v57  ;;  %v616_v14 = vmul.f32 0.35355338, %v586_v57 }
 0x1c3   : > { %v676_v60 = vunpack.c.l.b16 %v624_v59  ;;  %v620_v15 = vpack.c.bf16 %v616_v14, %v616_v14  ;;  %v860_v14 = vld [vmem:[%s1820_s5] sm:$0xf] }
 0x1c5   : > { %v677_v62 = vpack.c.b16 %v676_v60, %v676_v60 }
 0x1c6   : > { %v587_v63 = vpop.f32.mrf.mxu2 }
 0x1c7   : > { %678 = vrot.lane.b32.xlu1 %v677_v62, %s1485_s21 }
 0x1cf   : > { %702 = vrot.lane.b32.xlu1 %v701_v2, %s1485_s21  ;;  %s431_s21 = scalar_lea.vmem [#allocation2], %s1229_s17  ;;  %s1440_s17 = scalar_lea.hbm %s1828_s13, 16 }
 0x1d0   : > { %s1163_s22 = sshll.u32 %s431_s21, 4  ;;  %s1164_s22 = int_to_ptr.vmem [resolvable:$true] %s1163_s22 }
 0x20b   : > { %v630_v3 = vpop.permute.xlu2 %629 }
 0x20c   : > { %v636_v4 = vsel %vm631_vm5, %v630_v3, 0 }
 0x20d   : > { %645 = vmatpush.bf16.xpose.msrb.mxu0 %v636_v4 }
 0x213   : > { %v655_v7 = vpop.permute.xlu2 %654 }
 0x214   : > { %1267 = vmatmul.msk.bf16.vlgmr.msrb.gmra.mxu0 %vm631_vm5, %v618_v6  ;;  %v660_v9 = vsel %vm631_vm5, %v655_v7, 0 }
 0x215   : > { %669 = vmatpush.bf16.xpose.msra.mxu1 %v660_v9 }
 0x21c   : > { %1268 = vmatmul.msk.bf16.vlgmr.msra.gmra.mxu1 %vm631_vm5, %v619_v11 }
 0x239   : > { %v679_v12 = vpop.permute.xlu1 %678 }
 0x23a   : > { %v684_v13 = vsel %vm631_vm5, %v679_v12, 0 }
 0x23b   : > { %693 = vmatpush.bf16.xpose.msra.mxu2 %v684_v13 }
 0x241   : > { %v703_v16 = vpop.permute.xlu1 %702 }
 0x242   : > { %1269 = vmatmul.msk.bf16.vlgmr.msra.gmra.mxu2 %vm631_vm5, %v620_v15  ;;  %v708_v17 = vsel %vm631_vm5, %v703_v16, 0  ;;  %v868_v15 = vsel %vm776_vm6, %v860_v14, 0  ;;  %v1394_v14 = vld [vmem:[%s1825_s10] ss:$0 sm:$0xff] }
 0x243   : > { %717 = vmatpush.bf16.xpose.msrb.mxu3 %v708_v17 }
 0x24a   : > { %1270 = vmatmul.msk.bf16.vlgmr.msrb.gmra.mxu3 %vm631_vm5, %v621_v19  ;;  %v863_v19 = vld [vmem:[%s1820_s5 + $0xc] sm:$0xf] }
 0x291   : > { %v647_v20 = vpop.f32.mrf.mxu0 }
 0x292   : > { %v723_v21 = vsel %vm631_vm5, %v647_v20, -inf }
 0x293   : > { %724 = vmax.xlane.f32.xlu2 %v723_v21  ;;  %v862_v21 = vld [vmem:[%s1820_s5 + $0x8] sm:$0xf] }
 0x299   : > { %v649_v22 = vpop.f32.mrf.mxu0  ;;  %v671_v23 = vpop.f32.mrf.mxu1 }
 0x29a   : > { %v726_v24 = vsel %vm631_vm5, %v671_v23, -inf  ;;  %v906_v22 = vsel %vm776_vm6, %v862_v21, 0 }
 0x29b   : > { %727 = vmax.xlane.f32.xlu0 %v726_v24 }
 0x2a1   : > { %v673_v25 = vpop.f32.mrf.mxu1 }
 0x2c5   : > { %v695_v26 = vpop.f32.mrf.mxu2 }
 0x2c6   : > { %v729_v27 = vsel %vm631_vm5, %v695_v26, -inf }
 0x2c7   : > { %730 = vmax.xlane.f32.xlu0 %v729_v27 }
 0x2cd   : > { %v697_v28 = vpop.f32.mrf.mxu2  ;;  %v719_v29 = vpop.f32.mrf.mxu3 }
 0x2ce   : > { %v732_v30 = vsel %vm631_vm5, %v719_v29, -inf }
 0x2cf   : > { %733 = vmax.xlane.f32.xlu1 %v732_v30 }
 0x2d5   : > { %v721_v31 = vpop.f32.mrf.mxu3 }
 0x2db   : > { %814 = vrot.lane.b32.xlu0 %v677_v62, %s1486_s24 }
 0x306   : > { %v725_v32 = vpop.xlane.xlu2 %724 }
 0x307   : > { %v735_v33 = vsub.f32 %v647_v20, %v725_v32  ;;  %v925_v20 = vsel %vm776_vm6, %v863_v19, 0  ;;  %v1339_v19 = vld [vmem:[%s1826_s11 + $0x20] sm:$0xff] }
 0x309   : > { %v739_v34 = vmul.f32 1.442695, %v735_v33 }
 0x30b   : > { %1400 = vpow2.f32 %v739_v34 }
 0x30e   : > { %v728_v35 = vpop.xlane.xlu0 %727 }
 0x30f   : > { %v736_v36 = vsub.f32 %v671_v23, %v728_v35  ;;  %v861_v23 = vld [vmem:[%s1820_s5 + $0x4] sm:$0xf] }
 0x310   : > { %v887_v24 = vsel %vm776_vm6, %v861_v23, 0  ;;  %v1338_v23 = vld [vmem:[%s1826_s11 + $0x18] sm:$0xff] }
 0x311   : > { %v1401_v37 = vpop.eup %1400  ;;  %v741_v38 = vmul.f32 1.442695, %v736_v36 }
 0x312   : > { %v747_v39 = vsel %vm631_vm5, %v1401_v37, 0.0 }
 0x313   : > { %1402 = vpow2.f32 %v741_v38  ;;  %748 = vadd.xlane.f32.xlu2 %v747_v39 }
 0x319   : > { %v1403_v40 = vpop.eup %1402 }
 0x31a   : > { %v750_v41 = vsel %vm631_vm5, %v1403_v40, 0.0 }
 0x31b   : > { %751 = vadd.xlane.f32.xlu1 %v750_v41 }
 0x32b   : > { %835 = vrot.lane.b32.xlu2 %v701_v2, %s1486_s24 }
 0x334   : > { %771 = vrot.lane.b32.xlu1 %v1660_v47, %s1486_s24 }
 0x33a   : > { %v731_v42 = vpop.xlane.xlu0 %730 }
 0x33b   : > { %v737_v45 = vsub.f32 %v695_v26, %v731_v42 }
 0x33d   : > { %v743_v48 = vmul.f32 1.442695, %v737_v45  ;;  %v1391_v45 = vld [vmem:[%s1821_s6] ss:$0 sm:$0xff] }
 0x342   : > { %v734_v43 = vpop.xlane.xlu1 %733 }
 0x343   : > { %v738_v44 = vsub.f32 %v719_v29, %v734_v43 }
 0x345   : > { %v745_v46 = vmul.f32 1.442695, %v738_v44 }
 0x347   : > { %1404 = vpow2.f32 %v745_v46 }
 0x348   : > { %1406 = vpow2.f32 %v743_v48 }
 0x34d   : > { %v1405_v49 = vpop.eup %1404  ;;  %v815_v50 = vpop.permute.xlu0 %814 }
 0x34e   : > { %v820_v51 = vsel %vm776_vm6, %v815_v50, 0  ;;  %v756_v53 = vsel %vm631_vm5, %v1405_v49, 0.0  ;;  %v1407_v54 = vpop.eup %1406 }
 0x34f   : > { %757 = vadd.xlane.f32.xlu0 %v756_v53  ;;  %829 = vmatpush.bf16.msrb.mxu2 %v820_v51  ;;  %v753_v47 = vsel %vm631_vm5, %v1407_v54, 0.0 }
 0x353   : > { %915 = vmatpush.bf16.msra.mxu2 %v906_v22 }
 0x357   : > { %754 = vadd.xlane.f32.xlu0 %v753_v47 }
 0x36b   : > { %793 = vrot.lane.b32.xlu0 %v1663_v52, %s1486_s24  ;;  %s1436_s24 = scalar_lea.hbm %s1435_s2, 8 }
 0x36c   : > { %p1437_p11 = scmp.ne.s32.totalorder %s1435_s2, %s1436_s24  ;;  %p1442_p1 = scmp.lt.s32.totalorder %s1440_s17, %s1436_s24 }
 0x36e   : > { %p1438_p12 = pnand %p1437_p11, %p1595_p5  ;;  %p1443_p2 = por %p1442_p1, %p1441_p0 }
 0x370   : > { %p1439_p13 = pneg %p1438_p12 }
 0x372   : > { %p1444_p3 = pnand %p1443_p2, %p1439_p13 }
 0x386   : > { %v749_v55 = vpop.xlane.xlu2 %748 }
 0x387   : > { %1408 = vrcp.f32 %v749_v55 }
 0x38d   : > { %v1409_v59 = vpop.eup %1408 }
 0x38e   : > { %v836_v56 = vpop.permute.xlu2 %835  ;;  %v752_v58 = vpop.xlane.xlu1 %751  ;;  %v763_v60 = vmul.f32 %v1409_v59, %v1401_v37  ;;  %v1334_v59 = vld [vmem:[%s1824_s9 + $0x8] sm:$0xff] }
 0x38f   : > { %v841_v57 = vsel %vm776_vm6, %v836_v56, 0 }
 0x390   : > { %850 = vmatpush.bf16.msra.mxu3 %v841_v57  ;;  %v767_v63 = vpack.c.bf16 %v763_v60, %v763_v60 }
 0x394   : > { %934 = vmatpush.bf16.msrb.mxu3 %v925_v20 }
 0x3a6   : > { %v772_v61 = vpop.permute.xlu1 %771 }
 0x3a7   : > { %v778_v62 = vsel %vm776_vm6, %v772_v61, 0 }
 0x3a8   : > { %787 = vmatpush.bf16.msra.mxu0 %v778_v62 }
 0x3ab   : > { %1271 = vmatmul.msk.bf16.vlgmr.msra.gmra.mxu0 %vm631_vm5, %v767_v63 }
 0x3ac   : > { %877 = vmatpush.bf16.msrb.mxu0 %v868_v15 }
 0x3b0   : > { %1015 = vmatpush.bf16.msra.mxu0 %v1334_v59 }
 0x3c2   : > { %v758_v1 = vpop.xlane.xlu0 %757 }
 0x3c3   : > { %1410 = vrcp.f32 %v758_v1 }
 0x3c9   : > { %v1411_v2 = vpop.eup %1410 }
 0x3ca   : > { %v766_v52 = vmul.f32 %v1411_v2, %v1405_v49  ;;  %v755_v3 = vpop.xlane.xlu0 %754 }
 0x3cb   : > { %1412 = vrcp.f32 %v755_v3 }
 0x3cc   : > { %v770_v4 = vpack.c.bf16 %v766_v52, %v766_v52  ;;  %1414 = vrcp.f32 %v752_v58 }
 0x3ce   : > { %1274 = vmatmul.msk.bf16.vlgmr.msra.gmra.mxu3 %vm631_vm5, %v770_v4 }
 0x3d1   : > { %v1413_v5 = vpop.eup %1412 }
 0x3d2   : > { %v765_v6 = vmul.f32 %v1413_v5, %v1407_v54  ;;  %v1415_v9 = vpop.eup %1414  ;;  %v1392_v5 = vld [vmem:[%s1822_s7] ss:$0 sm:$0xff] }
 0x3d3   : > { %v764_v10 = vmul.f32 %v1415_v9, %v1403_v40 }
 0x3d4   : > { %v769_v7 = vpack.c.bf16 %v765_v6, %v765_v6 }
 0x3d5   : > { %v768_v13 = vpack.c.bf16 %v764_v10, %v764_v10 }
 0x3d6   : > { %1273 = vmatmul.msk.bf16.vlgmr.msrb.gmra.mxu2 %vm631_vm5, %v769_v7 }
 0x3dd   : > { %v794_v11 = vpop.permute.xlu0 %793 }
 0x3de   : > { %v799_v12 = vsel %vm776_vm6, %v794_v11, 0 }
 0x3df   : > { %808 = vmatpush.bf16.msrb.mxu1 %v799_v12  ;;  %v1342_v12 = vld [vmem:[%s1826_s11 + $0x38] sm:$0xff] }
 0x3e2   : > { %1272 = vmatmul.msk.bf16.vlgmr.msrb.gmra.mxu1 %vm631_vm5, %v768_v13  ;;  %v1341_v13 = vld [vmem:[%s1826_s11 + $0x30] sm:$0xff] }
 0x3e3   : > { %896 = vmatpush.bf16.msra.mxu1 %v887_v24 }
 0x3e7   : > { %1135 = vmatpush.bf16.msrb.mxu1 %v1342_v12 }
 0x3eb   : > { %1136 = vmatpush.bf16.msrb.mxu1 %v1341_v13 }
 0x428   : > { %v789_v16 = vpop.f32.mrf.mxu0 }
 0x429   : > { %v856_v17 = vpack.c.bf16 %v789_v16, %v789_v16  ;;  %v1340_v16 = vld [vmem:[%s1826_s11 + $0x28] sm:$0xff] }
 0x42a   : > { %1137 = vmatpush.bf16.msrb.mxu1 %v1340_v16 }
 0x42b   : > { %1275 = vmatmul.msk.bf16.vlgmr.msrb.gmra.mxu0 %vm631_vm5, %v856_v17 }
 0x42e   : > { %1138 = vmatpush.bf16.msrb.mxu1 %v1339_v19 }
 0x430   : > { %v791_v18 = vpop.f32.mrf.mxu0 }
 0x432   : > { %1139 = vmatpush.bf16.msrb.mxu1 %v1338_v23 }
 0x451   : > { %v852_v25 = vpop.f32.mrf.mxu3 }
 0x452   : > { %v859_v26 = vpack.c.bf16 %v852_v25, %v852_v25 }
 0x454   : > { %1278 = vmatmul.msk.bf16.vlgmr.msrb.gmra.mxu3 %vm631_vm5, %v859_v26 }
 0x459   : > { %v831_v27 = vpop.f32.mrf.mxu2  ;;  %v854_v28 = vpop.f32.mrf.mxu3 }
 0x45a   : > { %v858_v29 = vpack.c.bf16 %v831_v27, %v831_v27  ;;  %v1337_v28 = vld [vmem:[%s1826_s11 + $0x10] sm:$0xff] }
 0x45b   : > { %1140 = vmatpush.bf16.msrb.mxu1 %v1337_v28 }
 0x45c   : > { %1277 = vmatmul.msk.bf16.vlgmr.msra.gmra.mxu2 %vm631_vm5, %v858_v29 }
 0x45f   : > { %v810_v30 = vpop.f32.mrf.mxu1 }
 0x460   : > { %v857_v31 = vpack.c.bf16 %v810_v30, %v810_v30 }
 0x461   : > { %v833_v32 = vpop.f32.mrf.mxu2 }
 0x462   : > { %1276 = vmatmul.msk.bf16.vlgmr.msra.gmra.mxu1 %vm631_vm5, %v857_v31 }
 0x467   : > { %v812_v33 = vpop.f32.mrf.mxu1 }
 0x468   : > { %v1336_v33 = vld [vmem:[%s1826_s11 + $0x8] sm:$0xff] }
 0x469   : > { %1141 = vmatpush.bf16.msrb.mxu1 %v1336_v33 }
 0x4a8   : > { %v879_v34 = vpop.f32.mrf.mxu0 }
 0x4a9   : > { %v940_v39 = vsel %vm440_vm0, %v879_v34, 0.0 }
 0x4b0   : > { %v881_v35 = vpop.f32.mrf.mxu0 }
 0x4d7   : > { %v936_v36 = vpop.f32.mrf.mxu3 }
 0x4d8   : > { %v945_v46 = vsel %vm440_vm0, %v936_v36, 0.0 }
 0x4df   : > { %v898_v37 = vpop.f32.mrf.mxu1  ;;  %v917_v38 = vpop.f32.mrf.mxu2 }
 0x4e0   : > { %v941_v40 = vsel %vm440_vm0, %v898_v37, 0.0  ;;  %v938_v41 = vpop.f32.mrf.mxu3  ;;  %v943_v43 = vsel %vm440_vm0, %v917_v38, 0.0  ;;  %v1335_v37 = vld [vmem:[%s1826_s11] sm:$0xff] }
 0x4e1   : > { %v942_v42 = vadd.f32 %v941_v40, %v940_v39  ;;  %1142 = vmatpush.bf16.msrb.mxu1 %v1335_v37 }
 0x4e3   : > { %v944_v44 = vadd.f32 %v943_v43, %v942_v42 }
 0x4e5   : > { %v946_v48 = vadd.f32 %v945_v46, %v944_v44 }
 0x4e7   : > { %v951_v49 = vadd.f32 %v1391_v45, %v946_v48  ;;  %v900_v50 = vpop.f32.mrf.mxu1  ;;  %v919_v51 = vpop.f32.mrf.mxu2 }
 0x4e9   : > { %v1730_v53 = vadd.f32 %v951_v49, %v1610_v0  ;;  %v1333_v0 = vld [vmem:[%s1824_s9] sm:$0xff] }
 0x4ea   : > { %1016 = vmatpush.bf16.msra.mxu0 %v1333_v0 }
 0x4eb   : > { %v955_v54 = vsel %vm440_vm0, %v1730_v53, 0.0 }
 0x4ec   : > { %956 = vadd.xlane.f32.xlu0 %v955_v54 }
 0x55f   : > { %v957_v47 = vpop.xlane.xlu0 %956 }
 0x560   : > { %v958_v55 = vmul.f32 %v957_v47, %v1614_v8 }
 0x562   : > { %v959_v56 = vsub.f32 %v1730_v53, %v958_v55 }
 0x564   : > { %v960_v57 = vmul.f32 %v959_v56, %v959_v56 }
 0x566   : > { %v961_v58 = vsel %vm440_vm0, %v960_v57, 0.0 }
 0x567   : > { %962 = vadd.xlane.f32.xlu2 %v961_v58 }
 0x5da   : > { %v963_v60 = vpop.xlane.xlu2 %962 }
 0x5db   : > { %v964_v61 = vmul.f32 %v963_v60, %v1614_v8  ;;  %v1393_v8 = vld [vmem:[%s1823_s8] ss:$0 sm:$0xff] }
 0x5dd   : > { %v965_v62 = vadd.f32 1e-05, %v964_v61 }
 0x5df   : > { %1416 = vrsqrt.f32 %v965_v62  ;;  %vm972_vm8 = vweird.f32 %v965_v62 }
 0x5e5   : > { %v1417_v63 = vpop.eup %1416 }
 0x5e6   : > { %v967_v1 = vmul.f32 %v1417_v63, %v965_v62  ;;  %vm973_vm7 = vweird.f32 %v1417_v63 }
 0x5e7   : > { %vm974_vm9 = vmor %vm972_vm8, %vm973_vm7 }
 0x5e8   : > { %v968_v2 = vmul.f32 %v1417_v63, %v967_v1 }
 0x5ea   : > { %v969_v52 = vmul.f32 0.5, %v968_v2  ;;  %v1395_v2 = vld [vmem:[%s1827_s12] ss:$0 sm:$0xff] }
 0x5ec   : > { %v970_v3 = vsub.f32 1.5, %v969_v52 }
 0x5ee   : > { %v971_v4 = vmul.f32 %v1417_v63, %v970_v3 }
 0x5f0   : > { %v975_v6 = vsel %vm974_vm9, %v1417_v63, %v971_v4 }
 0x5f1   : > { %v976_v7 = vmul.f32 %v975_v6, %v959_v56 }
 0x5f3   : > { %v980_v9 = vmul.f32 %v1392_v5, %v976_v7 }
 0x5f5   : > { %v984_v10 = vadd.f32 %v1393_v8, %v980_v9 }
 0x5f7   : > { %v985_v11 = vpack.c.bf16 %v984_v10, %v984_v10 }
 0x5f9   : > { %1287 = vmatmul.msk.bf16.vlgmr.msra.gmra.mxu0 %vm440_vm0, %v985_v11 }
 0x676   : > { %v1018_v15 = vpop.f32.mrf.mxu0 }
 0x677   : > { %v1019_v17 = vadd.f32 %v1394_v14, %v1018_v15 }
 0x679   : > { %v1023_v18 = vmul.f32 0.70710677, %v1019_v17  ;;  %v1022_v61 = vmul.f32 0.5, %v1019_v17 }
 0x67b   : > { %v1024_v20 = vmul.f32 %v1023_v18, %v1023_v18 }
 0x67d   : > { %v1025_v21 = vmin.f32 %v1024_v20, 16.0 }
 0x67e   : > { %v1020_v22 = vpop.f32.mrf.mxu0 }
 0x67f   : > { %v1026_v24 = vmul.f32 2.1237322e-06, %v1025_v21  ;;  %v1037_v25 = vmul.f32 3.8918573e-05, %v1025_v21 }
 0x681   : > { %v1027_v26 = vadd.f32 0.00028619796, %v1026_v24  ;;  %v1038_v27 = vadd.f32 0.001143296, %v1037_v25 }
 0x683   : > { %v1028_v29 = vmul.f32 %v1027_v26, %v1025_v21  ;;  %v1039_v30 = vmul.f32 %v1038_v27, %v1025_v21 }
 0x685   : > { %v1040_v31 = vadd.f32 0.014752088, %v1039_v30  ;;  %v1029_v32 = vadd.f32 0.0036580483, %v1028_v29 }
 0x687   : > { %v1041_v34 = vmul.f32 %v1040_v31, %v1025_v21  ;;  %v1030_v36 = vmul.f32 %v1029_v32, %v1025_v21 }
 0x689   : > { %v1042_v35 = vadd.f32 0.112945676, %v1041_v34  ;;  %v1031_v40 = vadd.f32 0.05243302, %v1030_v36 }
 0x68b   : > { %v1043_v38 = vmul.f32 %v1042_v35, %v1025_v21  ;;  %v1032_v43 = vmul.f32 %v1031_v40, %v1025_v21 }
 0x68d   : > { %v1044_v39 = vadd.f32 0.4994258, %v1043_v38  ;;  %v1033_v44 = vadd.f32 0.18741608, %v1032_v43 }
 0x68f   : > { %v1045_v41 = vmul.f32 %v1044_v39, %v1025_v21  ;;  %v1034_v46 = vmul.f32 %v1033_v44, %v1025_v21 }
 0x691   : > { %v1046_v42 = vadd.f32 1.0, %v1045_v41  ;;  %v1035_v51 = vadd.f32 1.1283791, %v1034_v46 }
 0x693   : > { %1418 = vrcp.f32 %v1046_v42  ;;  %v1058_v50 = vand.u32 2147483648, %v1046_v42  ;;  %v1056_v47 = vand.u32 2147483647, %v1046_v42  ;;  %vm1052_vm11 = vweird.f32 %v1046_v42 }
 0x694   : > { %v1036_v57 = vmul.f32 %v1035_v51, %v1023_v18 }
 0x695   : > { %v1059_v56 = vor.u32 1.1754944e-38, %v1058_v50  ;;  %vm1057_vm13 = vcmp.eq.f32.partialorder %v1056_v47, 8.507059e+37 }
 0x699   : > { %v1419_v45 = vpop.eup %1418 }
 0x69a   : > { %v1048_v48 = vmul.f32 %v1419_v45, %v1046_v42  ;;  %vm1053_vm10 = vweird.f32 %v1419_v45 }
 0x69b   : > { %vm1054_vm12 = vmor %vm1052_vm11, %vm1053_vm10 }
 0x69c   : > { %v1049_v49 = vsub.f32 1.0, %v1048_v48 }
 0x69e   : > { %v1050_v54 = vmul.f32 %v1419_v45, %v1049_v49 }
 0x6a0   : > { %v1051_v55 = vadd.f32 %v1419_v45, %v1050_v54 }
 0x6a2   : > { %v1055_v58 = vsel %vm1054_vm12, %v1419_v45, %v1051_v55 }
 0x6a3   : > { %v1060_v59 = vsel %vm1057_vm13, %v1059_v56, %v1055_v58 }
 0x6a4   : > { %v1061_v0 = vmul.f32 %v1060_v59, %v1036_v57 }
 0x6a6   : > { %v1288_v60 = vclamps-f32 %v1061_v0, 1.0 }
 0x6a8   : > { %v1064_v62 = vadd.f32 1.0, %v1288_v60 }
 0x6aa   : > { %v1065_v63 = vmul.f32 %v1064_v62, %v1022_v61 }
 0x6ac   : > { %v1066_v1 = vpack.c.bf16 %v1065_v63, %v1065_v63 }
 0x6ae   : > { %1143 = vmatmul.bf16.vlgmr.msrb.gmra.mxu1 %v1066_v1 }
 0x72b   : > { %v1144_v52 = vpop.f32.mrf.mxu1 }
 0x72c   : > { %v1145_v3 = vadd.f32 %v1395_v2, %v1144_v52 }
 0x72e   : > { %v1148_v4 = vadd.f32 %v1145_v3, %v1730_v53 }
 0x730   : > { %1149 = vst.msk [vmem:[%s431_s21] sm:$0xff] %vm440_vm0, %v1148_v4 }
 0x731   : > { %1447 = shalt.err (!%p1444_p3)
}
 0x732   : > { %1343 = dma.vmem_to_hbm [thread:$0]  (%p1595_p5), %s1164_s22, 128, %s1166_s1, %s1151_s29  }
 0x733   : > { %v1146_v53 = vpop.f32.mrf.mxu1 }
 0x734 PF: > { %p1349_p4 = scmp.ge.s32.totalorder %s1482_s28, 2  ;;  %s1177_s0 = sand.u32 1, %s1470_s25  }
 0x735   : > { %s1178_s20 = scalar_lea.sflag [#allocation3], %s1177_s0 }
 0x736   : > { %p1346_p7 = pnand %p1349_p4, %p1599_p6 }
 0x738   : > { %p1347_p8 = pneg %p1346_p7 }
 0x73a   : > { %1465 = dma.done.wait (%p1347_p8), %s1178_s20, 128  }
 0x73b   : > { %1467 = vsyncadd (%p1347_p8), %s1178_s20, 4294967168  ;;  %s1838_s2 = sld [smem:[#allocation5_spill]]  ;;  %p23_p9 = scmp.ge.s32.totalorder %s1582_s14, 4  }
 0x73c   : > { %s1839_s25 = smov %s1474_s26  ;;  %s1840_s26 = smov %s1478_s27 }
 0x73d   : > { %s1842_s28 = smov %s1582_s14  ;;  %25 = sbr.rel (!%p23_p9) target bundleno = 7 (0x7), region = 107 }
 0x741   : > { %s1841_s27 = smov %s1838_s2 }
 0x742   :  { %1184 = vsyncpa [#allocation3], 1 }
 0x743   :  { %1186 = vsyncpa [#allocation3 + $0x1], 1 }

</bundles_post_ra>
